<compile_context>
chip_gen: v7x
topology: tpu7x:2x2x1
jax: 0.10.0
libtpu: 0.0.40
codegen_flags: <defaults>
</compile_context>

<pallas_src>
import functools

import jax
import jax.numpy as jnp
from jax import lax
from jax.experimental import pallas as pl
from jax.experimental.pallas import tpu as pltpu

Z_DIM = 32          # stand-in for z_dim (=256 in the PyTorch module)
C0 = 128            # stand-in for 1024
C1 = 64             # stand-in for 512
IMG_C = 3
NUM_CLASSES = 2
NUM_STAGES = 7
NEG_SLOPE = 0.2
BN_EPS = 1e-5
MXU_DTYPE = jnp.bfloat16     # matmul operand dtype (accumulation stays f32)
ACT_DTYPE = jnp.bfloat16     # inter-stage activation dtype


def _round_up(x, m):
    return ((x + m - 1) // m) * m


# ---------------------------------------------------------------------------
# Pallas kernels
# ---------------------------------------------------------------------------
def _initial_kernel(noise_ref, emb_ref, w_ref, shift_ref, o_ref):
    """(noise * label_emb) @ W_deconv1 (BN scale pre-folded) -> +shift -> LReLU."""
    z = (noise_ref[...] * emb_ref[...]).astype(MXU_DTYPE)
    y = jnp.dot(z, w_ref[...], preferred_element_type=jnp.float32)
    y = y + shift_ref[...]
    y = jnp.where(y >= 0, y, NEG_SLOPE * y)
    o_ref[...] = y.astype(o_ref.dtype)


def _conv3x3_fused_kernel(xf_ref, w_ref, shift_ref, o_ref, lhs_ref, *,
                          H_tile, W, Wp, upsample):
    """Fused 3x3 conv (stride 1, pad 1) + folded BN + LeakyReLU (+ nearest-2x).

    xf_ref : (1, L, Cin) bf16. Zero-padded NHWC image with rows flattened at a
             pitch of Wp = round_up(W+2, 8), L = (H+3)*Wp.  Grid-invariant
             along the H-tile axis (resident in VMEM).
    w_ref  : (9*Cin, Nout) bf16, tap-major rows, BN scale folded into columns.
             Nout = 2*Cout when the nearest-2x W-duplication is folded in.
    lhs_ref: (H_tile*Wp, 9*Cin) bf16 VMEM scratch -- in-kernel K-packed im2col.
    o_ref  : (1, H_tile, 2, W, Nout) bf16 when upsample, else (1, H_tile, W, Nout).
    """
    r = pl.program_id(1)
    M = H_tile * Wp                       # rows of this tile (wrap cols included)
    cin = xf_ref.shape[-1]
    row0 = pl.multiple_of(r * M, 8)       # M is a multiple of 8 (Wp % 8 == 0)

    # Pack the 9 taps once into a K = 9*Cin LHS (misaligned dx shifts done once).
    for dy in range(3):
        for dx in range(3):
            t = dy * 3 + dx
            lhs_ref[:, t * cin:(t + 1) * cin] = xf_ref[0, pl.ds(row0 + dy * Wp + dx, M), :]

    acc = jnp.dot(lhs_ref[...], w_ref[...], preferred_element_type=jnp.float32)
    y = acc + shift_ref[...]                              # folded BN (scale in W)
    y = jnp.where(y >= 0, y, NEG_SLOPE * y)               # LeakyReLU(0.2)
    n = y.shape[-1]
    yv = y.reshape(H_tile, Wp, n)[:, :W, :].astype(o_ref.dtype)   # drop wrap cols
    # TODO(synk): lane-dense stores (flatten W*Nout into the lane dim) would
    # avoid masked vst for Nout < 128; needs an in-kernel minor-dim relayout.
    if upsample:
        # nearest-2x: W-duplication already inside the widened matmul output,
        # H-duplication realized by writing each (bf16) row block twice.
        o_ref[0, :, 0, :, :] = yv
        o_ref[0, :, 1, :, :] = yv
    else:
        o_ref[0, :, :, :] = yv


def _to_rgb_kernel(x_ref, w_ref, b_ref, o_ref):
    """1x1 conv + bias + tanh.  bf16 NHWC activation in, f32 NCHW image out."""
    x = x_ref[0].astype(jnp.float32)               # (h_t, W, Cin)
    w = w_ref[...]                                 # (IMG_C, Cin) f32
    for c in range(IMG_C):
        y = jnp.sum(x * w[c, :], axis=-1) + b_ref[c]
        o_ref[0, c, :, :] = jnp.tanh(y)


# ---------------------------------------------------------------------------
# pallas_call wrappers
# ---------------------------------------------------------------------------
def initial_matmul(noise, emb, ip):
    """Deconv1 on a 1x1 input is a pure matmul; rows padded to >= 8 sublanes."""
    b = noise.shape[0]
    bp = _round_up(max(b, 8), 8)
    noise_p = jnp.pad(noise, ((0, bp - b), (0, 0)))
    emb_p = jnp.pad(emb, ((0, bp - b), (0, 0)))
    n = ip["w"].shape[1]
    out = pl.pallas_call(
        _initial_kernel,
        out_shape=jax.ShapeDtypeStruct((bp, n), ACT_DTYPE),
    )(noise_p, emb_p, ip["w"], ip["shift"])
    return out[:b].reshape(b, 4, 4, C0)            # NHWC (columns ordered y,x,co)


def conv_block(x, cp):
    """Fused 3x3 conv + folded BN + LeakyReLU (+ fused nearest-2x).  bf16 NHWC."""
    b, h, w, cin = x.shape
    cout, upsample = cp["cout"], cp["upsample"]
    nout = cp["wmat"].shape[-1]
    wp = _round_up(w + 2, 8)
    l = (h + 3) * wp
    # Zero pad in bf16: 1 top/left (conv halo), extra right/bottom so the
    # row-flattened taps are contiguous slices; wrap cols dropped in-kernel.
    xpad = jnp.pad(x, ((0, 0), (1, 2), (1, wp - w - 1), (0, 0)))
    xf = xpad.reshape(b, l, cin)

    th = h if h <= 16 else 16                      # H-tile (powers of two divide)
    n_tiles = h // th
    tile_m = th * wp

    if upsample:
        out_shape = (b, h, 2, w, nout)
        out_spec = pl.BlockSpec((1, th, 2, w, nout), lambda i, r: (i, r, 0, 0, 0))
        out_elems = b * h * 2 * w * nout
    else:
        out_shape = (b, h, w, nout)
        out_spec = pl.BlockSpec((1, th, w, nout), lambda i, r: (i, r, 0, 0))
        out_elems = b * h * w * nout

    flops = 2 * b * (h * wp) * 9 * cin * nout
    bytes_acc = 2 * (b * l * cin + out_elems + 9 * cin * nout) + 4 * nout

    kernel = functools.partial(_conv3x3_fused_kernel, H_tile=th, W=w, Wp=wp,
                               upsample=upsample)
    o = pl.pallas_call(
        kernel,
        out_shape=jax.ShapeDtypeStruct(out_shape, ACT_DTYPE),
        grid=(b, n_tiles),
        in_specs=[pl.BlockSpec((1, l, cin), lambda i, r: (i, 0, 0)),
                  pl.BlockSpec((9 * cin, nout), lambda i, r: (0, 0)),
                  pl.BlockSpec((1, nout), lambda i, r: (0, 0))],
        out_specs=out_spec,
        scratch_shapes=[pltpu.VMEM((tile_m, 9 * cin), MXU_DTYPE)],
        compiler_params=pltpu.CompilerParams(
            dimension_semantics=("parallel", "parallel"),
            vmem_limit_bytes=32 * 1024 * 1024),
        cost_estimate=pl.CostEstimate(flops=int(flops), transcendentals=0,
                                      bytes_accessed=int(bytes_acc)),
    )(xf, cp["wmat"], cp["shift"])

    if upsample:
        # (B, H, 2, W, 2*Cout) -> (B, 2H, 2W, Cout): pure row-major reshape.
        return o.reshape(b, 2 * h, 2 * w, cout)
    return o


def to_rgb(x, rp):
    """1x1 conv + tanh head: bf16 NHWC activation in -> f32 NCHW image out."""
    b, h, w, cin = x.shape
    h_t = h if h <= 64 else 64       # power-of-two h => h % h_t == 0 always here
    flops = 2 * b * h * w * cin * IMG_C
    bytes_acc = 2 * b * h * w * cin + 4 * (IMG_C * cin + IMG_C + b * IMG_C * h * w)
    return pl.pallas_call(
        _to_rgb_kernel,
        out_shape=jax.ShapeDtypeStruct((b, IMG_C, h, w), jnp.float32),
        grid=(b, h // h_t),
        in_specs=[pl.BlockSpec((1, h_t, w, cin), lambda i, r: (i, r, 0, 0)),
                  pl.BlockSpec((IMG_C, cin), lambda i, r: (0, 0)),
                  pl.BlockSpec(memory_space=pltpu.MemorySpace.SMEM)],
        out_specs=pl.BlockSpec((1, IMG_C, h_t, w), lambda i, r: (i, 0, r, 0)),
        compiler_params=pltpu.CompilerParams(
            dimension_semantics=("parallel", "parallel")),
        cost_estimate=pl.CostEstimate(flops=int(flops),
                                      transcendentals=int(b * IMG_C * h * w),
                                      bytes_accessed=int(bytes_acc)),
    )(x, rp["w"], rp["b"])


# ---------------------------------------------------------------------------
# Parameters (raw, PyTorch-layout) and one-time kernel-ready preparation
# ---------------------------------------------------------------------------
def init_params(key):
    keys = iter(jax.random.split(key, 256))
    nk = lambda: next(keys)

    def bn_stats(c):
        return {"gamma": 1.0 + 0.1 * jax.random.normal(nk(), (c,), jnp.float32),
                "beta": 0.1 * jax.random.normal(nk(), (c,), jnp.float32),
                "mean": 0.1 * jax.random.normal(nk(), (c,), jnp.float32),
                "var": jax.random.uniform(nk(), (c,), jnp.float32, 0.5, 1.5)}

    p = {"embed": jax.random.normal(nk(), (NUM_CLASSES, Z_DIM), jnp.float32),
         # ConvTranspose2d(Z, C0, 4, 1, 0, bias=False): weight (Z, C0, 4, 4)
         "w_deconv1": 0.05 * jax.random.normal(nk(), (Z_DIM, C0, 4, 4), jnp.float32),
         "bn1": bn_stats(C0),
         # ConvTranspose2d(C0, C1, 3, 1, 1, bias=False): weight (C0, C1, 3, 3)
         "w_deconv2": 0.02 * jax.random.normal(nk(), (C0, C1, 3, 3), jnp.float32),
         "bn2": bn_stats(C1),
         # initial_to_rgb: Conv2d(C1, 3, 1, 1, 0) + Tanh
         "rgb0_w": 0.05 * jax.random.normal(nk(), (IMG_C, C1, 1, 1), jnp.float32),
         "rgb0_b": 0.05 * jax.random.normal(nk(), (IMG_C,), jnp.float32)}
    blocks, to_rgbs = [], []
    in_ch = C1
    for _ in range(NUM_STAGES - 1):
        out_ch = in_ch // 2
        blocks.append({"w": 0.05 * jax.random.normal(nk(), (out_ch, in_ch, 3, 3),
                                                     jnp.float32),
                       "bn": bn_stats(out_ch)})
        to_rgbs.append({"w": 0.05 * jax.random.normal(nk(), (IMG_C, out_ch, 1, 1),
                                                      jnp.float32),
                        "b": 0.05 * jax.random.normal(nk(), (IMG_C,), jnp.float32)})
        in_ch = out_ch
    p["blocks"] = blocks
    p["to_rgb"] = to_rgbs
    return p


def _bn_fold(gamma, beta, mean, var):
    scale = gamma / jnp.sqrt(var + BN_EPS)
    return scale, beta - mean * scale


def _prep_conv(k_conv, scale, shift, upsample):
    # k_conv: regular-conv weight (Cout, Cin, 3, 3) -> (tap=dy*3+dx, ci, co),
    # BN scale folded into the output columns (conv has no bias).
    cout, cin = int(k_conv.shape[0]), int(k_conv.shape[1])
    wm = k_conv.transpose(2, 3, 1, 0).reshape(9, cin, cout)
    wm = wm * scale[None, None, :]
    if upsample:
        # nearest-2x along W folded into the matmul: duplicate output columns.
        wm = jnp.concatenate([wm, wm], axis=-1)
        shift = jnp.tile(shift, 2)
    nout = wm.shape[-1]
    return {"wmat": wm.reshape(9 * cin, nout).astype(MXU_DTYPE),
            "shift": shift[None, :].astype(jnp.float32),
            "cout": cout, "upsample": upsample}


def prepare_params(p):
    """One-time weight/BN preparation (hoisted out of the per-call forward)."""
    s1, h1 = _bn_fold(**p["bn1"])
    s2, h2 = _bn_fold(**p["bn2"])
    # deconv1 as matmul; columns ordered (y, x, co) so the output reshapes
    # straight into NHWC.  BN scale folded into the columns.
    w_init = p["w_deconv1"].transpose(0, 2, 3, 1).reshape(Z_DIM, 16 * C0)
    w_init = (w_init * jnp.tile(s1, 16)[None, :]).astype(MXU_DTYPE)
    return {
        "embed": p["embed"],
        "init": {"w": w_init,
                 "shift": jnp.tile(h1, 16)[None, :].astype(jnp.float32)},
        # ConvTranspose2d(C0,C1,3,1,1) == Conv2d with channel-swapped, spatially
        # flipped kernel (stride 1, pad 1).
        "conv0": _prep_conv(
            jnp.flip(p["w_deconv2"], axis=(2, 3)).transpose(1, 0, 2, 3),
            s2, h2, upsample=False),
        "blocks": [_prep_conv(blk["w"], *_bn_fold(**blk["bn"]), upsample=True)
                   for blk in p["blocks"]],
        "rgb0": {"w": p["rgb0_w"].reshape(IMG_C, C1), "b": p["rgb0_b"]},
        "to_rgb": [{"w": r["w"].reshape(IMG_C, r["w"].shape[1]), "b": r["b"]}
                   for r in p["to_rgb"]],
    }


# ---------------------------------------------------------------------------
# Pallas forward pass (mirrors ConditionalProgressiveGenerator.forward)
# ---------------------------------------------------------------------------
def generator_forward(prep, noise, labels, current_stage=0, alpha=1.0):
    emb = prep["embed"][labels]                              # embedding gather (glue)
    x = initial_matmul(noise, emb, prep["init"])             # (B, 4, 4, C0) bf16 NHWC
    x = conv_block(x, prep["conv0"])                         # (B, 4, 4, C1)
    # TODO(synk): Dropout2d(0.2) is train-time stochastic; eval-mode identity here.

    if current_stage == 0:
        return to_rgb(x, prep["rgb0"])                       # (B, 3, 4, 4) f32 NCHW

    x_prev = x
    for i in range(current_stage - 1):
        x_prev = conv_block(x_prev, prep["blocks"][i])
    x_cur = conv_block(x_prev, prep["blocks"][current_stage - 1])

    if alpha < 1.0:
        if current_stage == 1:
            x_old = to_rgb(x_prev, prep["rgb0"])
        else:
            x_old = to_rgb(x_prev, prep["to_rgb"][current_stage - 2])
        x_old = jnp.repeat(jnp.repeat(x_old, 2, axis=2), 2, axis=3)   # small RGB image
        x_new = to_rgb(x_cur, prep["to_rgb"][current_stage - 1])
        return alpha * x_new + (1.0 - alpha) * x_old

    return to_rgb(x_cur, prep["to_rgb"][current_stage - 1])


# ---------------------------------------------------------------------------
# Pure-JAX NCHW reference (same folded-BN / bf16-operand / f32-accum policy)
# ---------------------------------------------------------------------------
def _ref_lrelu(x):
    return jnp.where(x >= 0, x, NEG_SLOPE * x)


def _ref_conv_bn_lrelu(x, k, bn):
    scale, shift = _bn_fold(**bn)
    kf = (k * scale[:, None, None, None]).astype(MXU_DTYPE)
    y = lax.conv_general_dilated(
        x.astype(MXU_DTYPE), kf, window_strides=(1, 1),
        padding=((1, 1), (1, 1)), dimension_numbers=("NCHW", "OIHW", "NCHW"),
        preferred_element_type=jnp.float32)
    return _ref_lrelu(y + shift[None, :, None, None])


def _ref_rgb(x, w, b):
    xb = x.astype(MXU_DTYPE).astype(jnp.float32)      # match bf16 activation store
    y = jnp.einsum("bchw,oc->bohw", xb, w.reshape(IMG_C, -1))
    return jnp.tanh(y + b[None, :, None, None])


def _ref_block(x, blk):
    y = _ref_conv_bn_lrelu(x, blk["w"], blk["bn"])
    return jnp.repeat(jnp.repeat(y, 2, axis=2), 2, axis=3)


def reference_forward(params, noise, labels, current_stage=0, alpha=1.0):
    emb = params["embed"][labels]
    z = (noise * emb).astype(MXU_DTYPE)
    s1, h1 = _bn_fold(**params["bn1"])
    w1 = (params["w_deconv1"] * s1[None, :, None, None]).astype(MXU_DTYPE)
    y = jnp.einsum("bi,iohw->bohw", z, w1,
                   preferred_element_type=jnp.float32)          # (B, C0, 4, 4)
    y = _ref_lrelu(y + h1[None, :, None, None])
    k2 = jnp.flip(params["w_deconv2"], axis=(2, 3)).transpose(1, 0, 2, 3)
    x = _ref_conv_bn_lrelu(y, k2, params["bn2"])

    if current_stage == 0:
        return _ref_rgb(x, params["rgb0_w"], params["rgb0_b"])
    x_prev = x
    for i in range(current_stage - 1):
        x_prev = _ref_block(x_prev, params["blocks"][i])
    x_cur = _ref_block(x_prev, params["blocks"][current_stage - 1])
    if alpha < 1.0:
        if current_stage == 1:
            x_old = _ref_rgb(x_prev, params["rgb0_w"], params["rgb0_b"])
        else:
            r = params["to_rgb"][current_stage - 2]
            x_old = _ref_rgb(x_prev, r["w"], r["b"])
        x_old = jnp.repeat(jnp.repeat(x_old, 2, axis=2), 2, axis=3)
        r = params["to_rgb"][current_stage - 1]
        x_new = _ref_rgb(x_cur, r["w"], r["b"])
        return alpha * x_new + (1.0 - alpha) * x_old
    r = params["to_rgb"][current_stage - 1]
    return _ref_rgb(x_cur, r["w"], r["b"])


if __name__ == "__main__":
    key = jax.random.PRNGKey(0)
    pkey, nkey, lkey = jax.random.split(key, 3)
    params = init_params(pkey)
    prep = prepare_params(params)

    B = 2
    noise = jax.random.normal(nkey, (B, Z_DIM), jnp.float32)
    labels = jax.random.randint(lkey, (B,), 0, NUM_CLASSES, dtype=jnp.int32)

    def check(stage, alpha, hw):
        out = jax.block_until_ready(
            generator_forward(prep, noise, labels, current_stage=stage, alpha=alpha))
        assert out.shape == (B, IMG_C, hw, hw), out.shape
        ref = jax.block_until_ready(
            reference_forward(params, noise, labels, current_stage=stage, alpha=alpha))
        err = float(jnp.max(jnp.abs(out - ref)))
        assert err < 1e-2, f"stage={stage} alpha={alpha} max_abs_err={err}"

    check(0, 1.0, 4)     # default module state -> (B, 3, 4, 4)
    check(2, 0.7, 16)    # progressive fade-in path (alpha < 1) -> (B, 3, 16, 16)
    check(4, 1.0, 64)    # deeper progressive path -> (B, 3, 64, 64)

    print("KERNEL_OK")
</pallas_src>

<mosaic_0001>
module attributes {stable_mosaic.version = 11 : i64} {
  func.func @_initial_kernel(%arg0: memref<8x32xf32, #tpu.memory_space<vmem>>, %arg1: memref<8x32xf32, #tpu.memory_space<vmem>>, %arg2: memref<32x2048xbf16, #tpu.memory_space<vmem>>, %arg3: memref<1x2048xf32, #tpu.memory_space<vmem>>, %arg4: memref<8x2048xbf16, #tpu.memory_space<vmem>>) attributes {dimension_semantics = [], scalar_prefetch = 0 : i64, scratch_operands = 0 : i64, tpu.core_type = #tpu.core_type<tc>} {
    %c0 = arith.constant 0 : index
    %c0_0 = arith.constant 0 : index
    %0 = vector.load %arg0[%c0, %c0_0] : memref<8x32xf32, #tpu.memory_space<vmem>>, vector<8x32xf32>
    %c0_1 = arith.constant 0 : index
    %c0_2 = arith.constant 0 : index
    %1 = vector.load %arg1[%c0_1, %c0_2] : memref<8x32xf32, #tpu.memory_space<vmem>>, vector<8x32xf32>
    %2 = arith.mulf %0, %1 : vector<8x32xf32>
    %3 = arith.truncf %2 : vector<8x32xf32> to vector<8x32xbf16>
    %c0_3 = arith.constant 0 : index
    %c0_4 = arith.constant 0 : index
    %4 = vector.load %arg2[%c0_3, %c0_4] : memref<32x2048xbf16, #tpu.memory_space<vmem>>, vector<32x2048xbf16>
    %cst = arith.constant dense<0.000000e+00> : vector<8x2048xf32>
    %5 = tpu.matmul %3, %4, %cst {dimension_numbers = #tpu.dot_dimension_numbers<[1], [0], [0], [1], [0, 0, 1, 1], [], []>} : vector<8x32xbf16>, vector<32x2048xbf16>, vector<8x2048xf32> -> vector<8x2048xf32>
    %c0_5 = arith.constant 0 : index
    %c0_6 = arith.constant 0 : index
    %6 = vector.load %arg3[%c0_5, %c0_6] : memref<1x2048xf32, #tpu.memory_space<vmem>>, vector<1x2048xf32>
    %7 = vector.broadcast %6 : vector<1x2048xf32> to vector<8x2048xf32>
    %8 = arith.addf %5, %7 : vector<8x2048xf32>
    %cst_7 = arith.constant 0.000000e+00 : f32
    %9 = vector.broadcast %cst_7 : f32 to vector<8x2048xf32>
    %10 = arith.cmpf oge, %8, %9 : vector<8x2048xf32>
    %cst_8 = arith.constant 2.000000e-01 : f32
    %11 = vector.broadcast %cst_8 : f32 to vector<8x2048xf32>
    %12 = arith.mulf %11, %8 : vector<8x2048xf32>
    %13 = arith.select %10, %8, %12 : vector<8x2048xi1>, vector<8x2048xf32>
    %14 = arith.truncf %13 : vector<8x2048xf32> to vector<8x2048xbf16>
    %c0_9 = arith.constant 0 : index
    %c0_10 = arith.constant 0 : index
    %15 = vector.load %arg4[%c0_9, %c0_10] : memref<8x2048xbf16, #tpu.memory_space<vmem>>, vector<8x2048xbf16>
    tpu.vector_store %arg4[%c0_9, %c0_10], %14 {strides = array<i32>} : memref<8x2048xbf16, #tpu.memory_space<vmem>>, vector<8x2048xbf16>,
    return
  }
}

</mosaic_0001>

<bundles_post_ra>
// kernel: tpu_custom_call.1
= control target key start
LH: loop header
LB: loop body
LE: loop exit
PB: predicated region body
PF: predicated region fallthrough
CT: control target
= control target key end

     0   :  { %9 = vsyncpa [#allocation3], 0  ;;  %s1160_s0 = inlined_call_operand.hbm [shape: f32[8,32], index: 0, kind: input, shape index: {}]   ;;  %s1161_s1 = inlined_call_operand.hbm [shape: f32[8,32], index: 1, kind: input, shape index: {}]   ;;  %s1162_s2 = inlined_call_operand.hbm [shape: bf16[32,2048], index: 2, kind: input, shape index: {}]   ;;  %s1163_s3 = inlined_call_operand.hbm [shape: f32[1,2048], index: 3, kind: input, shape index: {}]   ;;  %s1164_s4 = inlined_call_operand.hbm [shape: bf16[8,2048], index: 4, kind: output, shape index: {}]  }
   0x1   :  { %10 = vsyncpa [#allocation6], 0 }
   0x2   :  { %11 = vsyncpa [#allocation9], 0 }
   0x3   :  { %12 = vsyncpa [#allocation4], 0  ;;  %s999_s15 = smov [#allocation5]   ;;  %s1000_s17 = smov [#allocation2]  }
   0x4   :  { %s29_s16 = sshll.u32 %s999_s15, 4  ;;  %s19_s18 = sshll.u32 %s1000_s17, 4  ;;  %s30_s16 = int_to_ptr.vmem [resolvable:$true] %s29_s16  ;;  %s20_s18 = int_to_ptr.vmem [resolvable:$true] %s19_s18 }
   0x5   :  { %s881_s21 = scalar_lea.hbm %s1161_s1, 128 }
   0x6   :  { %p882_p0 = scmp.ne.s32.totalorder %s1161_s1, %s881_s21  ;;  %p885_p1 = scmp.lt.u32.totalorder %s881_s21, %s1161_s1 }
   0x8   :  { %p887_p2 = pnand %p885_p1, %p882_p0 }
   0xa   :  { %890 = shalt.err (!%p887_p2)
}
   0xb   :  { %s891_s26 = scalar_lea.vmem %s30_s16, 128  ;;  %p896_p4 = scmp.lt.s32.totalorder %s30_s16, %s30_s16 }
   0xc   :  { %p892_p3 = scmp.ne.s32.totalorder %s30_s16, %s891_s26  ;;  %p897_p5 = scmp.lt.s32.totalorder %s891_s26, %s891_s26 }
   0xe   :  { %p898_p6 = por %p897_p5, %p896_p4 }
  0x10   :  { %p899_p7 = pnand %p898_p6, %p892_p3 }
  0x12   :  { %902 = shalt.err (!%p899_p7)
}
  0x13   :  { %32 = dma.hbm_to_vmem [thread:$0]  %s1161_s1, 128, %s30_s16, [#allocation6]  }
  0x14   :  { %s903_s5 = scalar_lea.hbm %s1160_s0, 128 }
  0x15   :  { %p904_p8 = scmp.ne.s32.totalorder %s1160_s0, %s903_s5  ;;  %p907_p9 = scmp.lt.u32.totalorder %s903_s5, %s1160_s0 }
  0x17   :  { %p909_p10 = pnand %p907_p9, %p904_p8 }
  0x19   :  { %912 = shalt.err (!%p909_p10)
}
  0x1a   :  { %s913_s10 = scalar_lea.vmem %s20_s18, 128  ;;  %p918_p12 = scmp.lt.s32.totalorder %s20_s18, %s20_s18 }
  0x1b   :  { %p914_p11 = scmp.ne.s32.totalorder %s20_s18, %s913_s10  ;;  %p919_p13 = scmp.lt.s32.totalorder %s913_s10, %s913_s10 }
  0x1d   :  { %p920_p0 = por %p919_p13, %p918_p12 }
  0x1f   :  { %p921_p1 = pnand %p920_p0, %p914_p11 }
  0x21   :  { %924 = shalt.err (!%p921_p1)
}
  0x22   :  { %22 = dma.hbm_to_vmem [thread:$0]  %s1160_s0, 128, %s20_s18, [#allocation3]  }
  0x23   :  { %s1001_s12 = smov [#allocation7]   ;;  %s925_s16 = scalar_lea.hbm %s1162_s2, 4096 }
  0x24   :  { %s38_s13 = sshll.u32 %s1001_s12, 4  ;;  %p926_p2 = scmp.ne.s32.totalorder %s1162_s2, %s925_s16  ;;  %s39_s13 = int_to_ptr.vmem [resolvable:$true] %s38_s13 }
  0x25   :  { %p929_p3 = scmp.lt.u32.totalorder %s925_s16, %s1162_s2 }
  0x27   :  { %p931_p4 = pnand %p929_p3, %p926_p2 }
  0x29   :  { %934 = shalt.err (!%p931_p4)
}
  0x2a   :  { %s935_s22 = scalar_lea.vmem %s39_s13, 4096  ;;  %p940_p6 = scmp.lt.s32.totalorder %s39_s13, %s39_s13 }
  0x2b   :  { %p936_p5 = scmp.ne.s32.totalorder %s39_s13, %s935_s22  ;;  %p941_p7 = scmp.lt.s32.totalorder %s935_s22, %s935_s22 }
  0x2d   :  { %p942_p8 = por %p941_p7, %p940_p6 }
  0x2f   :  { %p943_p9 = pnand %p942_p8, %p936_p5 }
  0x31   :  { %946 = shalt.err (!%p943_p9)
}
  0x32   :  { %s1002_s0 = smov 1024   ;;  %s1003_s18 = smov 64  }
  0x33   :  { %44 = dma.hbm_to_vmem [thread:$0]  %s1162_s2, 4096, %s39_s13, [#allocation6], %s1002_s0, %s1002_s0, %s1003_s18  }
  0x34   :  { %s1004_s25 = smov [#allocation8]   ;;  %s947_s29 = scalar_lea.hbm %s1163_s3, 256 }
  0x35   :  { %s51_s26 = sshll.u32 %s1004_s25, 4  ;;  %p948_p10 = scmp.ne.s32.totalorder %s1163_s3, %s947_s29  ;;  %s52_s26 = int_to_ptr.vmem [resolvable:$true] %s51_s26 }
  0x36   :  { %p951_p11 = scmp.lt.u32.totalorder %s947_s29, %s1163_s3 }
  0x38   :  { %p953_p12 = pnand %p951_p11, %p948_p10 }
  0x3a   :  { %956 = shalt.err (!%p953_p12)
}
  0x3b   :  { %s957_s8 = scalar_lea.vmem %s52_s26, 256  ;;  %p962_p0 = scmp.lt.s32.totalorder %s52_s26, %s52_s26 }
  0x3c   :  { %p958_p13 = scmp.ne.s32.totalorder %s52_s26, %s957_s8  ;;  %p963_p1 = scmp.lt.s32.totalorder %s957_s8, %s957_s8 }
  0x3e   :  { %p964_p2 = por %p963_p1, %p962_p0 }
  0x40   :  { %p965_p3 = pnand %p964_p2, %p958_p13 }
  0x42   :  { %968 = shalt.err (!%p965_p3)
}
  0x43   :  { %54 = dma.hbm_to_vmem [thread:$0]  %s1163_s3, 256, %s52_s26, [#allocation9]  }
  0x44   :  { %991 = dma.done.wait [#allocation3], 128  }
  0x45   :  { %992 = vsyncadd [#allocation3], 4294967168 }
  0x46   :  { %993 = dma.done.wait [#allocation6], 4224  }
  0x47   :  { %994 = vsyncadd [#allocation6], 4294963072 }
  0x48   :  { %995 = dma.done.wait [#allocation9], 256  }
  0x49   :  { %996 = vsyncadd [#allocation9], 4294967040  ;;  %v1005_v0 = vmov 0   ;;  %v72_v1 = vld [vmem:[#allocation7] sm:$0xff]  ;;  %v73_v3 = vld [vmem:[#allocation7 + $0x8] sm:$0xff]  ;;  %vm348_vm0 = vcmask 261120  }
  0x4a   :  { %384 = vmatprep.mubr.bf16.mxu0 %v1005_v0  ;;  %425 = vmatprep.mubr.bf16.mxu1 %v1005_v0  ;;  %v80_v2 = vld [vmem:[#allocation7 + $0x40] sm:$0xff]  ;;  %v81_v5 = vld [vmem:[#allocation7 + $0x48] sm:$0xff]  ;;  %v68_v14 = vld [vmem:[#allocation2] sm:$0xff]  ;;  %s1006_s3 = smov [#allocation10]  }
  0x4b   :  { %v818_v4 = vcombine.high %v72_v1, %v80_v2  ;;  %v817_v6 = vcombine.low %v72_v1, %v80_v2  ;;  %v88_v7 = vld [vmem:[#allocation7 + $0x80] sm:$0xff]  ;;  %v820_v9 = vcombine.high %v73_v3, %v81_v5  ;;  %v819_v10 = vcombine.low %v73_v3, %v81_v5  ;;  %v89_v12 = vld [vmem:[#allocation7 + $0x88] sm:$0xff]  ;;  %v69_v16 = vld [vmem:[#allocation5] sm:$0xff]  ;;  %s806_s10 = sshll.u32 %s1006_s3, 4  ;;  %s807_s10 = int_to_ptr.vmem [resolvable:$true] %s806_s10 }
  0x4c   :  { %v96_v8 = vld [vmem:[#allocation7 + $0xc0] sm:$0xff]  ;;  %v97_v13 = vld [vmem:[#allocation7 + $0xc8] sm:$0xff]  ;;  %v74_v17 = vld [vmem:[#allocation7 + $0x10] sm:$0xff]  ;;  %v70_v20 = vmul.f32 %v69_v16, %v68_v14  ;;  %s969_s1 = scalar_lea.vmem %s807_s10, 1024  ;;  %p974_p5 = scmp.lt.s32.totalorder %s807_s10, %s807_s10 }
  0x4d   :  { %v834_v11 = vcombine.high %v88_v7, %v96_v8  ;;  %352 = vmatprep.subr.bf16.mxu0 %v818_v4  ;;  %v836_v15 = vcombine.high %v89_v12, %v97_v13  ;;  %v82_v18 = vld [vmem:[#allocation7 + $0x50] sm:$0xff]  ;;  %393 = vmatprep.subr.bf16.mxu1 %v820_v9  ;;  %v833_v19 = vcombine.low %v88_v7, %v96_v8  ;;  %v75_v21 = vld [vmem:[#allocation7 + $0x18] sm:$0xff]  ;;  %v76_v35 = vld [vmem:[#allocation7 + $0x20] sm:$0xff]  ;;  %p970_p4 = scmp.ne.s32.totalorder %s807_s10, %s969_s1  ;;  %p975_p6 = scmp.lt.s32.totalorder %s969_s1, %s969_s1 }
  0x4e   :  { %353 = vmatpush1.bf16.msra.mxu0 %v817_v6  ;;  %v83_v22 = vld [vmem:[#allocation7 + $0x58] sm:$0xff]  ;;  %394 = vmatpush1.bf16.msra.mxu1 %v819_v10  ;;  %v835_v23 = vcombine.low %v89_v12, %v97_v13  ;;  %v822_v24 = vcombine.high %v74_v17, %v82_v18  ;;  %v90_v26 = vld [vmem:[#allocation7 + $0x90] sm:$0xff]  ;;  %v1082_v28 = vpack.c.bf16 %v70_v20, %v70_v20  ;;  %v84_v36 = vld [vmem:[#allocation7 + $0x60] sm:$0xff]  ;;  %v108_v6 = vlaneseq }
  0x4f   :  { %354 = vmatprep.subr.bf16.mxu0 %v834_v11  ;;  %395 = vmatprep.subr.bf16.mxu1 %v836_v15  ;;  %v824_v25 = vcombine.high %v75_v21, %v83_v22  ;;  %v98_v27 = vld [vmem:[#allocation7 + $0xd0] sm:$0xff]  ;;  %v91_v29 = vld [vmem:[#allocation7 + $0x98] sm:$0xff]  ;;  %v821_v31 = vcombine.low %v74_v17, %v82_v18  ;;  %v823_v32 = vcombine.low %v75_v21, %v83_v22  ;;  %v77_v37 = vld [vmem:[#allocation7 + $0x28] sm:$0xff]  ;;  %p976_p7 = por %p975_p6, %p974_p5 }
  0x50   :  { %v99_v30 = vld [vmem:[#allocation7 + $0xd8] sm:$0xff]  ;;  %v838_v33 = vcombine.high %v90_v26, %v98_v27  ;;  %v85_v38 = vld [vmem:[#allocation7 + $0x68] sm:$0xff]  ;;  %v837_v39 = vcombine.low %v90_v26, %v98_v27  ;;  %v826_v41 = vcombine.high %v76_v35, %v84_v36  ;;  %v92_v43 = vld [vmem:[#allocation7 + $0xa0] sm:$0xff]  ;;  %v825_v47 = vcombine.low %v76_v35, %v84_v36 }
  0x51   :  { %v840_v34 = vcombine.high %v91_v29, %v99_v30  ;;  %v839_v40 = vcombine.low %v91_v29, %v99_v30  ;;  %v828_v42 = vcombine.high %v77_v37, %v85_v38  ;;  %v100_v44 = vld [vmem:[#allocation7 + $0xe0] sm:$0xff]  ;;  %v93_v45 = vld [vmem:[#allocation7 + $0xa8] sm:$0xff]  ;;  %v827_v48 = vcombine.low %v77_v37, %v85_v38  ;;  %v78_v51 = vld [vmem:[#allocation7 + $0x30] sm:$0xff]  ;;  %p977_p8 = pnand %p976_p7, %p970_p4 }
  0x52   :  { %355 = vmatpush1.bf16.msra.mxu0 %v833_v19  ;;  %396 = vmatpush1.bf16.msra.mxu1 %v835_v23  ;;  %v101_v46 = vld [vmem:[#allocation7 + $0xe8] sm:$0xff]  ;;  %v842_v49 = vcombine.high %v92_v43, %v100_v44  ;;  %v86_v52 = vld [vmem:[#allocation7 + $0x70] sm:$0xff]  ;;  %v79_v53 = vld [vmem:[#allocation7 + $0x38] sm:$0xff]  ;;  %v841_v55 = vcombine.low %v92_v43, %v100_v44  ;;  %v1106_v7 = vshrl.u32 %v108_v6, 7 }
  0x53   :  { %434 = vmatprep.subr.bf16.mxu0 %v822_v24  ;;  %475 = vmatprep.subr.bf16.mxu1 %v824_v25  ;;  %v844_v50 = vcombine.high %v93_v45, %v101_v46  ;;  %v87_v54 = vld [vmem:[#allocation7 + $0x78] sm:$0xff]  ;;  %v843_v56 = vcombine.low %v93_v45, %v101_v46  ;;  %v830_v57 = vcombine.high %v78_v51, %v86_v52  ;;  %v94_v59 = vld [vmem:[#allocation7 + $0xb0] sm:$0xff]  ;;  %v104_v9 = vld [vmem:[#allocation8] sm:$0xff] }
  0x54   :  { %v832_v58 = vcombine.high %v79_v53, %v87_v54  ;;  %v102_v60 = vld [vmem:[#allocation7 + $0xf0] sm:$0xff]  ;;  %v95_v61 = vld [vmem:[#allocation7 + $0xb8] sm:$0xff]  ;;  %v829_v63 = vcombine.low %v78_v51, %v86_v52  ;;  %v831_v1 = vcombine.low %v79_v53, %v87_v54  ;;  %v110_v8 = vsub.s32 0, %v1106_v7  ;;  %v105_v54 = vld [vmem:[#allocation8 + $0x8] sm:$0xff] }
  0x55   :  { %849 = vmatmul.mubr.msk.bf16.vlgmr.msra.gmra.mrb[0].mxu0 %vm348_vm0, %v1082_v28  ;;  %850 = vmatmul.mubr.msk.bf16.vlgmr.msra.gmra.mrb[0].mxu1 %vm348_vm0, %v1082_v28  ;;  %v103_v62 = vld [vmem:[#allocation7 + $0xf8] sm:$0xff]  ;;  %v846_v2 = vcombine.high %v94_v59, %v102_v60  ;;  %v845_v4 = vcombine.low %v94_v59, %v102_v60  ;;  %v118_v10 = vsub.s32 2, %v1106_v7  ;;  %v114_v11 = vsub.s32 1, %v1106_v7 }
  0x56   :  { %435 = vmatpush1.bf16.msra.mxu0 %v821_v31  ;;  %476 = vmatpush1.bf16.msra.mxu1 %v823_v32  ;;  %v848_v3 = vcombine.high %v95_v61, %v103_v62  ;;  %v847_v5 = vcombine.low %v95_v61, %v103_v62  ;;  %v111_v12 = vrot.slane %v104_v9, %v110_v8  ;;  %v126_v20 = vsub.s32 4, %v1106_v7 }
  0x57   :  { %436 = vmatprep.subr.bf16.mxu0 %v838_v33  ;;  %477 = vmatprep.subr.bf16.mxu1 %v840_v34  ;;  %v119_v13 = vrot.slane %v104_v9, %v118_v10  ;;  %v115_v14 = vrot.slane %v104_v9, %v114_v11  ;;  %v134_v25 = vsub.s32 6, %v1106_v7  ;;  %v130_v26 = vsub.s32 5, %v1106_v7 }
  0x58   :  { %466 = vmatprep.mubr.bf16.mxu0 %v1005_v0  ;;  %507 = vmatprep.mubr.bf16.mxu1 %v1005_v0  ;;  %v138_v31 = vsub.s32 7, %v1106_v7  ;;  %v127_v37 = vrot.slane %v104_v9, %v126_v20 }
  0x5a   :  { %437 = vmatpush1.bf16.msra.mxu0 %v837_v39  ;;  %478 = vmatpush1.bf16.msra.mxu1 %v839_v40  ;;  %v135_v40 = vrot.slane %v104_v9, %v134_v25  ;;  %v139_v44 = vrot.slane %v104_v9, %v138_v31 }
  0x5b   :  { %516 = vmatprep.subr.bf16.mxu0 %v826_v41  ;;  %557 = vmatprep.subr.bf16.mxu1 %v828_v42  ;;  %v131_v41 = vrot.slane %v104_v9, %v130_v26 }
  0x5d   :  { %851 = vmatmul.mubr.msk.bf16.vlgmr.msra.gmra.mrb[4].mxu0 %vm348_vm0, %v1082_v28  ;;  %852 = vmatmul.mubr.msk.bf16.vlgmr.msra.gmra.mrb[4].mxu1 %vm348_vm0, %v1082_v28 }
  0x5e   :  { %517 = vmatpush1.bf16.msra.mxu0 %v825_v47  ;;  %558 = vmatpush1.bf16.msra.mxu1 %v827_v48 }
  0x5f   :  { %518 = vmatprep.subr.bf16.mxu0 %v842_v49  ;;  %559 = vmatprep.subr.bf16.mxu1 %v844_v50 }
  0x60   :  { %548 = vmatprep.mubr.bf16.mxu0 %v1005_v0  ;;  %589 = vmatprep.mubr.bf16.mxu1 %v1005_v0 }
  0x62   :  { %519 = vmatpush1.bf16.msra.mxu0 %v841_v55  ;;  %560 = vmatpush1.bf16.msra.mxu1 %v843_v56 }
  0x63   :  { %598 = vmatprep.subr.bf16.mxu0 %v830_v57  ;;  %639 = vmatprep.subr.bf16.mxu1 %v832_v58 }
  0x65   :  { %853 = vmatmul.mubr.msk.bf16.vlgmr.msra.gmra.mrb[8].mxu0 %vm348_vm0, %v1082_v28  ;;  %854 = vmatmul.mubr.msk.bf16.vlgmr.msra.gmra.mrb[8].mxu1 %vm348_vm0, %v1082_v28 }
  0x66   :  { %599 = vmatpush1.bf16.msra.mxu0 %v829_v63  ;;  %640 = vmatpush1.bf16.msra.mxu1 %v831_v1  ;;  %v143_v1 = vrot.slane %v105_v54, %v110_v8 }
  0x67   :  { %600 = vmatprep.subr.bf16.mxu0 %v846_v2  ;;  %641 = vmatprep.subr.bf16.mxu1 %v848_v3 }
  0x68   :  { %630 = vmatprep.mubr.bf16.mxu0 %v1005_v0  ;;  %671 = vmatprep.mubr.bf16.mxu1 %v1005_v0  ;;  %v122_v0 = vsub.s32 3, %v1106_v7 }
  0x6a   :  { %601 = vmatpush1.bf16.msra.mxu0 %v845_v4  ;;  %642 = vmatpush1.bf16.msra.mxu1 %v847_v5  ;;  %v123_v15 = vrot.slane %v104_v9, %v122_v0  ;;  %v151_v4 = vrot.slane %v105_v54, %v118_v10  ;;  %v147_v5 = vrot.slane %v105_v54, %v114_v11 }
  0x6d   :  { %855 = vmatmul.mubr.msk.bf16.vlgmr.msra.gmra.mrb[12].mxu0 %vm348_vm0, %v1082_v28  ;;  %856 = vmatmul.mubr.msk.bf16.vlgmr.msra.gmra.mrb[12].mxu1 %vm348_vm0, %v1082_v28 }
 0x128   :  { %v386_v16 = vpop.f32.mrb[0].mxu0  ;;  %v427_v18 = vpop.f32.mrb[0].mxu1 }
 0x129   :  { %v387_v17 = vadd.f32 %v386_v16, %v111_v12  ;;  %v388_v19 = vpop.f32.mrb[1].mxu0  ;;  %v428_v21 = vadd.f32 %v427_v18, %v119_v13  ;;  %v429_v23 = vpop.f32.mrb[1].mxu1  ;;  %v155_v12 = vrot.slane %v105_v54, %v122_v0 }
 0x12a   :  { %v389_v22 = vadd.f32 %v388_v19, %v115_v14  ;;  %v390_v24 = vpop.f32.mrb[2].mxu0  ;;  %v430_v28 = vadd.f32 %v429_v23, %v123_v15  ;;  %v431_v29 = vpop.f32.mrb[2].mxu1 }
 0x12b   :  { %vm680_vm1 = vcmp.ge.f32.partialorder %v387_v17, 0.0  ;;  %v696_v27 = vmul.f32 0.2, %v387_v17  ;;  %v391_v30 = vpop.f32.mrb[3].mxu0  ;;  %vm682_vm2 = vcmp.ge.f32.partialorder %v428_v21, 0.0  ;;  %v432_v36 = vpop.f32.mrb[3].mxu1 }
 0x12c   :  { %v698_v32 = vmul.f32 0.2, %v428_v21  ;;  %vm681_vm3 = vcmp.ge.f32.partialorder %v389_v22, 0.0  ;;  %v697_v33 = vmul.f32 0.2, %v389_v22  ;;  %vm683_vm4 = vcmp.ge.f32.partialorder %v430_v28, 0.0 }
 0x12d   :  { %v712_v34 = vsel %vm680_vm1, %v387_v17, %v696_v27  ;;  %v699_v35 = vmul.f32 0.2, %v430_v28  ;;  %v159_v30 = vrot.slane %v105_v54, %v126_v20 }
 0x12e   :  { %v714_v38 = vsel %vm682_vm2, %v428_v21, %v698_v32  ;;  %v713_v39 = vsel %vm681_vm3, %v389_v22, %v697_v33 }
 0x12f   :  { %v865_v42 = vpack.c.bf16 %v713_v39, %v712_v34  ;;  %v715_v43 = vsel %vm683_vm4, %v430_v28, %v699_v35  ;;  %v167_v34 = vrot.slane %v105_v54, %v134_v25  ;;  %v163_v35 = vrot.slane %v105_v54, %v130_v26 }
 0x130   :  { %v866_v45 = vpack.c.bf16 %v715_v43, %v714_v38  ;;  %v468_v46 = vpop.f32.mrb[4].mxu0  ;;  %v509_v48 = vpop.f32.mrb[4].mxu1  ;;  %v171_v38 = vrot.slane %v105_v54, %v138_v31 }
 0x131   :  { %792 = vst [vmem:[#allocation10] sm:$0xff] %v865_v42  ;;  %v469_v47 = vadd.f32 %v468_v46, %v127_v37  ;;  %v470_v49 = vpop.f32.mrb[5].mxu0  ;;  %v510_v50 = vadd.f32 %v509_v48, %v135_v40  ;;  %v511_v52 = vpop.f32.mrb[5].mxu1 }
 0x132   :  { %793 = vst [vmem:[#allocation10 + $0x8] sm:$0xff] %v866_v45  ;;  %v471_v51 = vadd.f32 %v470_v49, %v131_v41  ;;  %v472_v53 = vpop.f32.mrb[6].mxu0  ;;  %v512_v56 = vadd.f32 %v511_v52, %v139_v44  ;;  %v513_v57 = vpop.f32.mrb[6].mxu1 }
 0x133   :  { %vm684_vm5 = vcmp.ge.f32.partialorder %v469_v47, 0.0  ;;  %v700_v55 = vmul.f32 0.2, %v469_v47  ;;  %v473_v58 = vpop.f32.mrb[7].mxu0  ;;  %vm686_vm6 = vcmp.ge.f32.partialorder %v510_v50, 0.0  ;;  %v514_v63 = vpop.f32.mrb[7].mxu1 }
 0x134   :  { %v702_v59 = vmul.f32 0.2, %v510_v50  ;;  %vm685_vm7 = vcmp.ge.f32.partialorder %v471_v51, 0.0  ;;  %v701_v60 = vmul.f32 0.2, %v471_v51  ;;  %vm687_vm8 = vcmp.ge.f32.partialorder %v512_v56, 0.0 }
 0x135   :  { %v716_v61 = vsel %vm684_vm5, %v469_v47, %v700_v55  ;;  %v703_v62 = vmul.f32 0.2, %v512_v56 }
 0x136   :  { %v718_v2 = vsel %vm686_vm6, %v510_v50, %v702_v59  ;;  %v717_v3 = vsel %vm685_vm7, %v471_v51, %v701_v60 }
 0x137   :  { %v867_v6 = vpack.c.bf16 %v717_v3, %v716_v61  ;;  %v719_v9 = vsel %vm687_vm8, %v512_v56, %v703_v62 }
 0x138   :  { %v868_v13 = vpack.c.bf16 %v719_v9, %v718_v2  ;;  %v550_v14 = vpop.f32.mrb[8].mxu0  ;;  %v591_v16 = vpop.f32.mrb[8].mxu1 }
 0x139   :  { %794 = vst [vmem:[#allocation10 + $0x10] sm:$0xff] %v867_v6  ;;  %v551_v15 = vadd.f32 %v550_v14, %v143_v1  ;;  %v552_v17 = vpop.f32.mrb[9].mxu0  ;;  %v592_v8 = vadd.f32 %v591_v16, %v151_v4  ;;  %v593_v19 = vpop.f32.mrb[9].mxu1 }
 0x13a   :  { %795 = vst [vmem:[#allocation10 + $0x18] sm:$0xff] %v868_v13  ;;  %v553_v18 = vadd.f32 %v552_v17, %v147_v5  ;;  %v554_v21 = vpop.f32.mrb[10].mxu0  ;;  %v594_v22 = vadd.f32 %v593_v19, %v155_v12  ;;  %v595_v11 = vpop.f32.mrb[10].mxu1 }
 0x13b   :  { %vm688_vm9 = vcmp.ge.f32.partialorder %v551_v15, 0.0  ;;  %v704_v10 = vmul.f32 0.2, %v551_v15  ;;  %v555_v23 = vpop.f32.mrb[11].mxu0  ;;  %vm690_vm10 = vcmp.ge.f32.partialorder %v592_v8, 0.0  ;;  %v596_v29 = vpop.f32.mrb[11].mxu1 }
 0x13c   :  { %v706_v24 = vmul.f32 0.2, %v592_v8  ;;  %vm689_vm11 = vcmp.ge.f32.partialorder %v553_v18, 0.0  ;;  %v705_v0 = vmul.f32 0.2, %v553_v18  ;;  %vm691_vm12 = vcmp.ge.f32.partialorder %v594_v22, 0.0 }
 0x13d   :  { %v720_v27 = vsel %vm688_vm9, %v551_v15, %v704_v10  ;;  %v707_v28 = vmul.f32 0.2, %v594_v22 }
 0x13e   :  { %v722_v32 = vsel %vm690_vm10, %v592_v8, %v706_v24  ;;  %v721_v33 = vsel %vm689_vm11, %v553_v18, %v705_v0 }
 0x13f   :  { %v869_v36 = vpack.c.bf16 %v721_v33, %v720_v27  ;;  %v723_v37 = vsel %vm691_vm12, %v594_v22, %v707_v28 }
 0x140   :  { %v870_v39 = vpack.c.bf16 %v723_v37, %v722_v32  ;;  %v632_v40 = vpop.f32.mrb[12].mxu0  ;;  %v673_v42 = vpop.f32.mrb[12].mxu1 }
 0x141   :  { %796 = vst [vmem:[#allocation10 + $0x20] sm:$0xff] %v869_v36  ;;  %v633_v41 = vadd.f32 %v632_v40, %v159_v30  ;;  %v634_v43 = vpop.f32.mrb[13].mxu0  ;;  %v674_v20 = vadd.f32 %v673_v42, %v167_v34  ;;  %v675_v45 = vpop.f32.mrb[13].mxu1 }
 0x142   :  { %797 = vst [vmem:[#allocation10 + $0x28] sm:$0xff] %v870_v39  ;;  %v635_v44 = vadd.f32 %v634_v43, %v163_v35  ;;  %v636_v46 = vpop.f32.mrb[14].mxu0  ;;  %v676_v47 = vadd.f32 %v675_v45, %v171_v38  ;;  %v677_v26 = vpop.f32.mrb[14].mxu1 }
 0x143   :  { %vm692_vm13 = vcmp.ge.f32.partialorder %v633_v41, 0.0  ;;  %v708_v25 = vmul.f32 0.2, %v633_v41  ;;  %v637_v48 = vpop.f32.mrb[15].mxu0  ;;  %vm694_vm14 = vcmp.ge.f32.partialorder %v674_v20, 0.0  ;;  %v678_v51 = vpop.f32.mrb[15].mxu1 }
 0x144   :  { %v710_v49 = vmul.f32 0.2, %v674_v20  ;;  %vm693_vm15 = vcmp.ge.f32.partialorder %v635_v44, 0.0  ;;  %v709_v7 = vmul.f32 0.2, %v635_v44  ;;  %vm695_vm0 = vcmp.ge.f32.partialorder %v676_v47, 0.0 }
 0x145   :  { %v724_v31 = vsel %vm692_vm13, %v633_v41, %v708_v25  ;;  %v711_v50 = vmul.f32 0.2, %v676_v47 }
 0x146   :  { %v726_v52 = vsel %vm694_vm14, %v674_v20, %v710_v49  ;;  %v725_v53 = vsel %vm693_vm15, %v635_v44, %v709_v7 }
 0x147   :  { %v871_v54 = vpack.c.bf16 %v725_v53, %v724_v31  ;;  %v727_v55 = vsel %vm695_vm0, %v676_v47, %v711_v50 }
 0x148   :  { %v872_v56 = vpack.c.bf16 %v727_v55, %v726_v52 }
 0x149   :  { %798 = vst [vmem:[#allocation10 + $0x30] sm:$0xff] %v871_v54 }
 0x14a   :  { %799 = vst [vmem:[#allocation10 + $0x38] sm:$0xff] %v872_v56 }
 0x14b   :  { %980 = shalt.err (!%p977_p8)
}
 0x14c   :  { %s981_s13 = scalar_lea.hbm %s1164_s4, 1024 }
 0x14d   :  { %p982_p9 = scmp.ne.s32.totalorder %s1164_s4, %s981_s13  ;;  %p985_p10 = scmp.lt.u32.totalorder %s981_s13, %s1164_s4 }
 0x14f   :  { %p987_p11 = pnand %p985_p10, %p982_p9 }
 0x151   :  { %990 = shalt.err (!%p987_p11)
}
 0x152   :  { %809 = dma.vmem_to_hbm [thread:$0]  %s807_s10, 1024, %s1164_s4, [#allocation4]  }
 0x153   :  { %997 = dma.done.wait [#allocation4], 1024  }
 0x154   :  { %998 = vsyncadd [#allocation4], 4294966272 }
 0x155   :  { %813 = vsyncpa [#allocation3], 1 }
 0x156   :  { %814 = vsyncpa [#allocation6], 1 }
 0x157   :  { %815 = vsyncpa [#allocation9], 1 }
 0x158   :  { %816 = vsyncpa [#allocation4], 1 }

</bundles_post_ra>
